<compile_context>
chip_gen: v6e
topology: v6e:2x2x1
jax: 0.10.0
libtpu: 0.0.40
codegen_flags: <defaults>
</compile_context>

<pallas_src>
from typing import NamedTuple

import jax
import jax.numpy as jnp
from jax.experimental import pallas as pl
from jax.experimental.pallas import tpu as pltpu

_LANE = 128
_SUBLANE = 8
_NI_FULL_THRESHOLD = 4096   # below this the whole i-node axis is a single k-step
_NI_TILE = 2048             # reduction-axis tile when n_i is large (multiple of 128)


def _round_up(x, m):
    return (x + m - 1) // m * m


def _vmem_capacity_bytes():
    """Per-core VMEM capacity; falls back to the smallest generation (v7x: 64 MiB)."""
    try:
        return int(pltpu.get_tpu_info().vmem_capacity_bytes)
    except Exception:
        return 64 * 1024 * 1024


def _pipeline_vmem_bytes(tile_nd, tile_ni, feat, hid1, hid2, x_itemsize):
    adj = 2 * tile_nd * tile_ni * 2            # bf16 adjacency tile, double-buffered
    x = 2 * tile_ni * feat * x_itemsize        # node-feature tile, double-buffered
    out = 2 * tile_nd * _SUBLANE * 4           # narrow score slab, double-buffered
    acc = tile_nd * feat * 4                   # f32 accumulator scratch
    w = (feat * hid1 + hid1 * hid2 + hid2 * _SUBLANE + hid1 + hid2 + _SUBLANE) * 4
    return adj + x + out + acc + w


# ----------------------------------------------------------------------------
# One-time preparation (graph + parameters) -- do NOT redo per forward call
# ----------------------------------------------------------------------------
class GCGraphPlan(NamedTuple):
    adj: jax.Array          # (n_d_pad, n_i_pad) bfloat16 incidence matrix
    n_d: int
    n_i: int
    n_d_pad: int
    n_i_pad: int
    tile_nd: int
    tile_ni: int
    vmem_limit_bytes: int


def prepare_i2d_graph(i2d_adj, feat, x_itemsize=4):
    """Cast the 0/1 incidence matrix to bf16, pad it, and derive the tiling plan."""
    n_d, n_i = i2d_adj.shape
    hid1 = _round_up(max(feat // 2, 1), _LANE)
    hid2 = _round_up(max(feat // 4, 1), _LANE)

    vmem_cap = _vmem_capacity_bytes()
    vmem_budget = int(0.6 * vmem_cap)

    # Reduction (i-node) axis: one k-step when small; otherwise fixed 128-multiple
    # tiles so the adjacency tile stays bounded (v7x has only 64 MiB VMEM per TC).
    if n_i <= _NI_FULL_THRESHOLD:
        tile_ni, n_i_pad = n_i, n_i
    else:
        tile_ni = _NI_TILE
        n_i_pad = _round_up(n_i, tile_ni)

    # d-node (parallel) axis: single full tile when n_d is small; otherwise the
    # largest of {512, 256, 128} that fits the VMEM budget and still leaves >= 2
    # grid tiles so both v7x TensorCores get work.
    if n_d <= _LANE:
        tile_nd = _round_up(n_d, _SUBLANE)
    else:
        tile_nd = _LANE
        for cand in (512, 256, _LANE):
            fits = _pipeline_vmem_bytes(cand, tile_ni, feat, hid1, hid2,
                                        x_itemsize) <= vmem_budget
            if fits and pl.cdiv(n_d, cand) >= 2:
                tile_nd = cand
                break
    n_d_pad = _round_up(n_d, tile_nd)

    need = _pipeline_vmem_bytes(tile_nd, tile_ni, feat, hid1, hid2, x_itemsize)
    vmem_limit = int(min(max(int(1.5 * need), 32 * 1024 * 1024), int(0.9 * vmem_cap)))

    # 0/1 incidence is exactly representable in bf16 -> halves HBM/DMA traffic.
    adj = jnp.zeros((n_d_pad, n_i_pad), jnp.bfloat16)
    adj = adj.at[:n_d, :n_i].set(i2d_adj.astype(jnp.bfloat16))

    return GCGraphPlan(adj, n_d, n_i, n_d_pad, n_i_pad, tile_nd, tile_ni, vmem_limit)


class GCParamsPlan(NamedTuple):
    w1: jax.Array   # (feat, hid1)
    b1: jax.Array   # (1, hid1)
    w2: jax.Array   # (hid1, hid2)
    b2: jax.Array   # (1, hid2)
    w3: jax.Array   # (hid2, 8)
    b3: jax.Array   # (1, 8)


def prepare_d2score_params(d2score_params):
    """One-time lane-padding of the MLP head. Zero padding is exact through
    bias + LeakyReLU, so nothing leaks into the real columns."""
    w1, b1, w2, b2, w3, b3 = d2score_params
    feat, f2 = w1.shape
    f4 = w2.shape[1]
    hid1 = _round_up(max(f2, 1), _LANE)
    hid2 = _round_up(max(f4, 1), _LANE)
    f32 = jnp.float32
    w1p = jnp.zeros((feat, hid1), f32).at[:, :f2].set(w1.astype(f32))
    b1p = jnp.zeros((1, hid1), f32).at[:, :f2].set(b1.reshape(1, f2).astype(f32))
    w2p = jnp.zeros((hid1, hid2), f32).at[:f2, :f4].set(w2.astype(f32))
    b2p = jnp.zeros((1, hid2), f32).at[:, :f4].set(b2.reshape(1, f4).astype(f32))
    w3p = jnp.zeros((hid2, _SUBLANE), f32).at[:f4, :1].set(w3.reshape(f4, 1).astype(f32))
    b3p = jnp.zeros((1, _SUBLANE), f32).at[:, :1].set(b3.reshape(1, 1).astype(f32))
    return GCParamsPlan(w1p, b1p, w2p, b2p, w3p, b3p)


# ----------------------------------------------------------------------------
# Fused kernel: i2d aggregation (A @ X over a k-tiled reduction) -> d2score MLP
# ----------------------------------------------------------------------------
def _gc_fused_kernel(x_ref, adj_ref, w1_ref, b1_ref, w2_ref, b2_ref, w3_ref,
                     b3_ref, o_ref, acc_ref):
    k = pl.program_id(1)

    @pl.when(k == 0)
    def _init():
        acc_ref[...] = jnp.zeros_like(acc_ref)

    # i2s_layer: copy_u('h','mail') + sum('mail','h')  ==  A_tile @ X_tile (MXU).
    adj = adj_ref[...]
    x = x_ref[...]
    if x.dtype == jnp.bfloat16:
        # Full-rate bf16 x bf16 -> f32 MXU path (opt-in via feature_dtype).
        part = jnp.dot(adj, x, preferred_element_type=jnp.float32)
    else:
        # Exact path: adjacency stored bf16 for DMA, upcast for an f32 matmul.
        part = jnp.dot(adj.astype(jnp.float32), x, preferred_element_type=jnp.float32)
    acc_ref[...] += part

    @pl.when(k == pl.num_programs(1) - 1)
    def _finalize():
        d = acc_ref[...]
        # d2score: Linear -> LeakyReLU(0.01) -> Linear -> LeakyReLU -> Linear.
        h = jnp.dot(d, w1_ref[...], preferred_element_type=jnp.float32) + b1_ref[...]
        h = jnp.where(h > 0, h, 0.01 * h)
        h = jnp.dot(h, w2_ref[...], preferred_element_type=jnp.float32) + b2_ref[...]
        h = jnp.where(h > 0, h, 0.01 * h)
        # Real score in lane 0 of a narrow 8-lane slab (16x less HBM writeback than
        # a 128-lane slab; output traffic is negligible vs the adjacency stream).
        o_ref[...] = jnp.dot(h, w3_ref[...], preferred_element_type=jnp.float32) + b3_ref[...]


# ----------------------------------------------------------------------------
# Forward wrapper
# ----------------------------------------------------------------------------
def gcconvolution_forward(r_node, i_node, graph_plan, params_plan, n_layers,
                          feature_dtype=jnp.float32):
    """Mirrors GCconvolution.forward with r2r / i2i / d2d treated as identity.

    r_node : (N_r, F) real-node features  (N_r == N_i)
    i_node : (N_i, F) image-node features
    returns: (N_d, 1) scores
    """
    assert r_node.shape == i_node.shape, "r2i add requires N_r == N_i and equal feat"
    n_i, feat = i_node.shape
    assert n_i == graph_plan.n_i, "graph plan was built for a different i-node count"

    # r2i applied n_layers times with identity r2r / i2i collapses to a single add,
    # hoisted out of the kernel (previously recomputed on the VPU per grid tile).
    x = i_node.astype(jnp.float32) + jnp.float32(n_layers) * r_node.astype(jnp.float32)
    x = x.astype(feature_dtype)
    if graph_plan.n_i_pad > n_i:
        x = jnp.zeros((graph_plan.n_i_pad, feat), x.dtype).at[:n_i, :].set(x)

    tile_nd, tile_ni = graph_plan.tile_nd, graph_plan.tile_ni
    n_d_pad, n_i_pad = graph_plan.n_d_pad, graph_plan.n_i_pad
    hid1 = params_plan.w1.shape[1]
    hid2 = params_plan.w2.shape[1]
    n_k = n_i_pad // tile_ni

    const = lambda i, k: (0, 0)

    def build_call(resident_kwargs):
        in_specs = [
            # node features: tiled along the k (reduction) axis
            pl.BlockSpec((tile_ni, feat), lambda i, k: (k, 0),
                         **(resident_kwargs if n_k == 1 else {})),
            # adjacency tile: the only stream that really moves per grid step
            pl.BlockSpec((tile_nd, tile_ni), lambda i, k: (i, k)),
            # MLP weights/biases: constant index -> VMEM resident, single-buffered
            pl.BlockSpec((feat, hid1), const, **resident_kwargs),
            pl.BlockSpec((1, hid1), const, **resident_kwargs),
            pl.BlockSpec((hid1, hid2), const, **resident_kwargs),
            pl.BlockSpec((1, hid2), const, **resident_kwargs),
            pl.BlockSpec((hid2, _SUBLANE), const, **resident_kwargs),
            pl.BlockSpec((1, _SUBLANE), const, **resident_kwargs),
        ]
        return pl.pallas_call(
            _gc_fused_kernel,
            out_shape=jax.ShapeDtypeStruct((n_d_pad, _SUBLANE), jnp.float32),
            grid_spec=pltpu.PrefetchScalarGridSpec(
                num_scalar_prefetch=0,
                grid=(n_d_pad // tile_nd, n_k),
                in_specs=in_specs,
                out_specs=pl.BlockSpec((tile_nd, _SUBLANE), lambda i, k: (i, 0)),
                scratch_shapes=[pltpu.VMEM((tile_nd, feat), jnp.float32)],
            ),
            compiler_params=pltpu.CompilerParams(
                dimension_semantics=("parallel", "arbitrary"),
                vmem_limit_bytes=graph_plan.vmem_limit_bytes,
            ),
        )

    args = (x, graph_plan.adj, params_plan.w1, params_plan.b1, params_plan.w2,
            params_plan.b2, params_plan.w3, params_plan.b3)
    try:
        out = build_call({"pipeline_mode": pl.Buffered(1)})(*args)
    except Exception:
        # Fallback: default double-buffering if single-buffer pipeline_mode is
        # unavailable in this JAX build (perf-only difference).
        out = build_call({})(*args)

    # Score sits in column 0; drop padding rows/lanes.
    return out[:graph_plan.n_d, :1]


# ----------------------------------------------------------------------------
# Deterministic parameter init (shapes from __init__: out_feats -> F/2 -> F/4 -> 1)
# ----------------------------------------------------------------------------
def init_d2score_params(key, out_feats):
    k1, k2, k3, k4, k5, k6 = jax.random.split(key, 6)
    f2, f4 = out_feats // 2, out_feats // 4
    w1 = jax.random.normal(k1, (out_feats, f2), jnp.float32) * 0.1
    b1 = jax.random.normal(k2, (1, f2), jnp.float32) * 0.1
    w2 = jax.random.normal(k3, (f2, f4), jnp.float32) * 0.1
    b2 = jax.random.normal(k4, (1, f4), jnp.float32) * 0.1
    w3 = jax.random.normal(k5, (f4, 1), jnp.float32) * 0.1
    b3 = jax.random.normal(k6, (1, 1), jnp.float32) * 0.1
    return (w1, b1, w2, b2, w3, b3)


if __name__ == "__main__":
    key = jax.random.PRNGKey(0)
    k_r, k_i, k_adj, k_p = jax.random.split(key, 4)

    N_R = 16          # real nodes
    N_I = 16          # image nodes (paired 1:1 with real nodes for the r2i add)
    N_D = 8           # dot nodes
    F = 32            # out_feats
    N_LAYERS = 2

    r_node = jax.random.normal(k_r, (N_R, F), jnp.float32)
    i_node = jax.random.normal(k_i, (N_I, F), jnp.float32)

    # Each i_nd connects to one d_nd -> dense 0/1 incidence matrix (N_D, N_I)
    assign = jax.random.randint(k_adj, (N_I,), 0, N_D)
    i2d_adj = (jnp.arange(N_D)[:, None] == assign[None, :]).astype(jnp.float32)

    raw_params = init_d2score_params(k_p, F)

    # One-time prep (padding / bf16 cast / tiling plan done once, not per call).
    graph_plan = prepare_i2d_graph(i2d_adj, feat=F)
    params_plan = prepare_d2score_params(raw_params)

    score = gcconvolution_forward(r_node, i_node, graph_plan, params_plan, N_LAYERS)
    score = jax.block_until_ready(score)

    # Pure-JAX reference (same math, no Pallas).
    i_ref = i_node
    for _ in range(N_LAYERS):
        i_ref = i_ref + r_node
    d_ref = i2d_adj @ i_ref
    w1, b1, w2, b2, w3, b3 = raw_params
    h = d_ref @ w1 + b1
    h = jnp.where(h > 0, h, 0.01 * h)
    h = h @ w2 + b2
    h = jnp.where(h > 0, h, 0.01 * h)
    ref = h @ w3 + b3

    assert score.shape == (N_D, 1)
    assert jnp.allclose(score, ref, atol=1e-4, rtol=1e-4)
    print("KERNEL_OK")
</pallas_src>

<mosaic_0001>
module attributes {stable_mosaic.version = 11 : i64} {
  func.func @_gc_fused_kernel(%arg0: i32, %arg1: i32, %arg2: memref<16x32xf32, #tpu.memory_space<vmem>>, %arg3: memref<8x16xbf16, #tpu.memory_space<vmem>>, %arg4: memref<32x128xf32, #tpu.memory_space<vmem>>, %arg5: memref<1x128xf32, #tpu.memory_space<vmem>>, %arg6: memref<128x128xf32, #tpu.memory_space<vmem>>, %arg7: memref<1x128xf32, #tpu.memory_space<vmem>>, %arg8: memref<128x8xf32, #tpu.memory_space<vmem>>, %arg9: memref<1x8xf32, #tpu.memory_space<vmem>>, %arg10: memref<8x8xf32, #tpu.memory_space<vmem>>, %arg11: memref<8x32xf32, #tpu.memory_space<vmem>>) attributes {dimension_semantics = [#tpu.dimension_semantics<parallel>, #tpu.dimension_semantics<arbitrary>], iteration_bounds = array<i64: 1, 1>, scalar_prefetch = 0 : i64, scratch_operands = 1 : i64, tpu.core_type = #tpu.core_type<tc>, window_params = [{pipeline_mode = #tpu.pipeline_mode<synchronous>, transform_indices = @transform_0, window_bounds = array<i64: 16, 32>}, {transform_indices = @transform_1, window_bounds = array<i64: 8, 16>}, {pipeline_mode = #tpu.pipeline_mode<synchronous>, transform_indices = @transform_2, window_bounds = array<i64: 32, 128>}, {pipeline_mode = #tpu.pipeline_mode<synchronous>, transform_indices = @transform_3, window_bounds = array<i64: 1, 128>}, {pipeline_mode = #tpu.pipeline_mode<synchronous>, transform_indices = @transform_4, window_bounds = array<i64: 128, 128>}, {pipeline_mode = #tpu.pipeline_mode<synchronous>, transform_indices = @transform_5, window_bounds = array<i64: 1, 128>}, {pipeline_mode = #tpu.pipeline_mode<synchronous>, transform_indices = @transform_6, window_bounds = array<i64: 128, 8>}, {pipeline_mode = #tpu.pipeline_mode<synchronous>, transform_indices = @transform_7, window_bounds = array<i64: 1, 8>}, {transform_indices = @transform_8, window_bounds = array<i64: 8, 8>}]} {
    %c0_i32 = arith.constant 0 : i32
    %0 = arith.cmpi eq, %arg1, %c0_i32 : i32
    %1 = arith.extui %0 : i1 to i32
    %c0_i32_0 = arith.constant 0 : i32
    %2 = arith.cmpi ne, %1, %c0_i32_0 : i32
    scf.if %2 {
      %cst_10 = arith.constant 0.000000e+00 : f32
      %13 = vector.broadcast %cst_10 : f32 to vector<8x32xf32>
      %c0_11 = arith.constant 0 : index
      %c0_12 = arith.constant 0 : index
      %14 = vector.load %arg11[%c0_11, %c0_12] : memref<8x32xf32, #tpu.memory_space<vmem>>, vector<8x32xf32>
      tpu.vector_store %arg11[%c0_11, %c0_12], %13 {strides = array<i32>} : memref<8x32xf32, #tpu.memory_space<vmem>>, vector<8x32xf32>,
    } else {
    }
    %c0 = arith.constant 0 : index
    %c0_1 = arith.constant 0 : index
    %3 = vector.load %arg3[%c0, %c0_1] : memref<8x16xbf16, #tpu.memory_space<vmem>>, vector<8x16xbf16>
    %c0_2 = arith.constant 0 : index
    %c0_3 = arith.constant 0 : index
    %4 = vector.load %arg2[%c0_2, %c0_3] : memref<16x32xf32, #tpu.memory_space<vmem>>, vector<16x32xf32>
    %5 = arith.extf %3 : vector<8x16xbf16> to vector<8x16xf32>
    %cst = arith.constant dense<0.000000e+00> : vector<8x32xf32>
    %6 = tpu.matmul %5, %4, %cst {dimension_numbers = #tpu.dot_dimension_numbers<[1], [0], [0], [1], [0, 0, 1, 1], [], []>} : vector<8x16xf32>, vector<16x32xf32>, vector<8x32xf32> -> vector<8x32xf32>
    %c0_4 = arith.constant 0 : index
    %c0_5 = arith.constant 0 : index
    %7 = vector.load %arg11[%c0_4, %c0_5] : memref<8x32xf32, #tpu.memory_space<vmem>>, vector<8x32xf32>
    %8 = arith.addf %7, %6 : vector<8x32xf32>
    %c0_6 = arith.constant 0 : index
    %c0_7 = arith.constant 0 : index
    %9 = vector.load %arg11[%c0_6, %c0_7] : memref<8x32xf32, #tpu.memory_space<vmem>>, vector<8x32xf32>
    tpu.vector_store %arg11[%c0_6, %c0_7], %8 {strides = array<i32>} : memref<8x32xf32, #tpu.memory_space<vmem>>, vector<8x32xf32>,
    %c0_i32_8 = arith.constant 0 : i32
    %10 = arith.cmpi eq, %arg1, %c0_i32_8 : i32
    %11 = arith.extui %10 : i1 to i32
    %c0_i32_9 = arith.constant 0 : i32
    %12 = arith.cmpi ne, %11, %c0_i32_9 : i32
    scf.if %12 {
      %c0_10 = arith.constant 0 : index
      %c0_11 = arith.constant 0 : index
      %13 = vector.load %arg11[%c0_10, %c0_11] : memref<8x32xf32, #tpu.memory_space<vmem>>, vector<8x32xf32>
      %c0_12 = arith.constant 0 : index
      %c0_13 = arith.constant 0 : index
      %14 = vector.load %arg4[%c0_12, %c0_13] : memref<32x128xf32, #tpu.memory_space<vmem>>, vector<32x128xf32>
      %cst_14 = arith.constant dense<0.000000e+00> : vector<8x128xf32>
      %15 = tpu.matmul %13, %14, %cst_14 {dimension_numbers = #tpu.dot_dimension_numbers<[1], [0], [0], [1], [0, 0, 1, 1], [], []>} : vector<8x32xf32>, vector<32x128xf32>, vector<8x128xf32> -> vector<8x128xf32>
      %c0_15 = arith.constant 0 : index
      %c0_16 = arith.constant 0 : index
      %16 = vector.load %arg5[%c0_15, %c0_16] : memref<1x128xf32, #tpu.memory_space<vmem>>, vector<1x128xf32>
      %17 = vector.broadcast %16 : vector<1x128xf32> to vector<8x128xf32>
      %18 = arith.addf %15, %17 : vector<8x128xf32>
      %cst_17 = arith.constant 0.000000e+00 : f32
      %19 = vector.broadcast %cst_17 : f32 to vector<8x128xf32>
      %20 = arith.cmpf ogt, %18, %19 : vector<8x128xf32>
      %cst_18 = arith.constant 0.00999999977 : f32
      %21 = vector.broadcast %cst_18 : f32 to vector<8x128xf32>
      %22 = arith.mulf %21, %18 : vector<8x128xf32>
      %23 = arith.select %20, %18, %22 : vector<8x128xi1>, vector<8x128xf32>
      %c0_19 = arith.constant 0 : index
      %c0_20 = arith.constant 0 : index
      %24 = vector.load %arg6[%c0_19, %c0_20] : memref<128x128xf32, #tpu.memory_space<vmem>>, vector<128x128xf32>
      %cst_21 = arith.constant dense<0.000000e+00> : vector<8x128xf32>
      %25 = tpu.matmul %23, %24, %cst_21 {dimension_numbers = #tpu.dot_dimension_numbers<[1], [0], [0], [1], [0, 0, 1, 1], [], []>} : vector<8x128xf32>, vector<128x128xf32>, vector<8x128xf32> -> vector<8x128xf32>
      %c0_22 = arith.constant 0 : index
      %c0_23 = arith.constant 0 : index
      %26 = vector.load %arg7[%c0_22, %c0_23] : memref<1x128xf32, #tpu.memory_space<vmem>>, vector<1x128xf32>
      %27 = vector.broadcast %26 : vector<1x128xf32> to vector<8x128xf32>
      %28 = arith.addf %25, %27 : vector<8x128xf32>
      %cst_24 = arith.constant 0.000000e+00 : f32
      %29 = vector.broadcast %cst_24 : f32 to vector<8x128xf32>
      %30 = arith.cmpf ogt, %28, %29 : vector<8x128xf32>
      %cst_25 = arith.constant 0.00999999977 : f32
      %31 = vector.broadcast %cst_25 : f32 to vector<8x128xf32>
      %32 = arith.mulf %31, %28 : vector<8x128xf32>
      %33 = arith.select %30, %28, %32 : vector<8x128xi1>, vector<8x128xf32>
      %c0_26 = arith.constant 0 : index
      %c0_27 = arith.constant 0 : index
      %34 = vector.load %arg8[%c0_26, %c0_27] : memref<128x8xf32, #tpu.memory_space<vmem>>, vector<128x8xf32>
      %cst_28 = arith.constant dense<0.000000e+00> : vector<8x8xf32>
      %35 = tpu.matmul %33, %34, %cst_28 {dimension_numbers = #tpu.dot_dimension_numbers<[1], [0], [0], [1], [0, 0, 1, 1], [], []>} : vector<8x128xf32>, vector<128x8xf32>, vector<8x8xf32> -> vector<8x8xf32>
      %c0_29 = arith.constant 0 : index
      %c0_30 = arith.constant 0 : index
      %36 = vector.load %arg9[%c0_29, %c0_30] : memref<1x8xf32, #tpu.memory_space<vmem>>, vector<1x8xf32>
      %37 = vector.broadcast %36 : vector<1x8xf32> to vector<8x8xf32>
      %38 = arith.addf %35, %37 : vector<8x8xf32>
      %c0_31 = arith.constant 0 : index
      %c0_32 = arith.constant 0 : index
      %39 = vector.load %arg10[%c0_31, %c0_32] : memref<8x8xf32, #tpu.memory_space<vmem>>, vector<8x8xf32>
      tpu.vector_store %arg10[%c0_31, %c0_32], %38 {strides = array<i32>} : memref<8x8xf32, #tpu.memory_space<vmem>>, vector<8x8xf32>,
    } else {
    }
    return
  }
  func.func @transform_0(%arg0: i32, %arg1: i32) -> (i32, i32) {
    %c0_i32 = arith.constant 0 : i32
    %c0_i32_0 = arith.constant 0 : i32
    return %arg1, %c0_i32 : i32, i32
  }
  func.func @transform_1(%arg0: i32, %arg1: i32) -> (i32, i32) {
    %c0_i32 = arith.constant 0 : i32
    return %arg0, %arg1 : i32, i32
  }
  func.func @transform_2(%arg0: i32, %arg1: i32) -> (i32, i32) {
    %c0_i32 = arith.constant 0 : i32
    %c0_i32_0 = arith.constant 0 : i32
    %c0_i32_1 = arith.constant 0 : i32
    return %c0_i32, %c0_i32_0 : i32, i32
  }
  func.func @transform_3(%arg0: i32, %arg1: i32) -> (i32, i32) {
    %c0_i32 = arith.constant 0 : i32
    %c0_i32_0 = arith.constant 0 : i32
    %c0_i32_1 = arith.constant 0 : i32
    return %c0_i32, %c0_i32_0 : i32, i32
  }
  func.func @transform_4(%arg0: i32, %arg1: i32) -> (i32, i32) {
    %c0_i32 = arith.constant 0 : i32
    %c0_i32_0 = arith.constant 0 : i32
    %c0_i32_1 = arith.constant 0 : i32
    return %c0_i32, %c0_i32_0 : i32, i32
  }
  func.func @transform_5(%arg0: i32, %arg1: i32) -> (i32, i32) {
    %c0_i32 = arith.constant 0 : i32
    %c0_i32_0 = arith.constant 0 : i32
    %c0_i32_1 = arith.constant 0 : i32
    return %c0_i32, %c0_i32_0 : i32, i32
  }
  func.func @transform_6(%arg0: i32, %arg1: i32) -> (i32, i32) {
    %c0_i32 = arith.constant 0 : i32
    %c0_i32_0 = arith.constant 0 : i32
    %c0_i32_1 = arith.constant 0 : i32
    return %c0_i32, %c0_i32_0 : i32, i32
  }
  func.func @transform_7(%arg0: i32, %arg1: i32) -> (i32, i32) {
    %c0_i32 = arith.constant 0 : i32
    %c0_i32_0 = arith.constant 0 : i32
    %c0_i32_1 = arith.constant 0 : i32
    return %c0_i32, %c0_i32_0 : i32, i32
  }
  func.func @transform_8(%arg0: i32, %arg1: i32) -> (i32, i32) {
    %c0_i32 = arith.constant 0 : i32
    %c0_i32_0 = arith.constant 0 : i32
    return %arg0, %c0_i32 : i32, i32
  }
}

module attributes {stable_mosaic.version = 11 : i64} {
  func.func @_gc_fused_kernel(%arg0: i32, %arg1: i32, %arg2: memref<16x32xf32, #tpu.memory_space<vmem>>, %arg3: memref<8x16xbf16, #tpu.memory_space<vmem>>, %arg4: memref<32x128xf32, #tpu.memory_space<vmem>>, %arg5: memref<1x128xf32, #tpu.memory_space<vmem>>, %arg6: memref<128x128xf32, #tpu.memory_space<vmem>>, %arg7: memref<1x128xf32, #tpu.memory_space<vmem>>, %arg8: memref<128x8xf32, #tpu.memory_space<vmem>>, %arg9: memref<1x8xf32, #tpu.memory_space<vmem>>, %arg10: memref<8x8xf32, #tpu.memory_space<vmem>>, %arg11: memref<8x32xf32, #tpu.memory_space<vmem>>) attributes {dimension_semantics = [#tpu.dimension_semantics<parallel>, #tpu.dimension_semantics<arbitrary>], iteration_bounds = array<i64: 1, 1>, scalar_prefetch = 0 : i64, scratch_operands = 1 : i64, tpu.core_type = #tpu.core_type<tc>, window_params = [{transform_indices = @transform_0, window_bounds = array<i64: 16, 32>}, {transform_indices = @transform_1, window_bounds = array<i64: 8, 16>}, {pipeline_mode = #tpu.pipeline_mode<synchronous>, transform_indices = @transform_2, window_bounds = array<i64: 32, 128>}, {pipeline_mode = #tpu.pipeline_mode<synchronous>, transform_indices = @transform_3, window_bounds = array<i64: 1, 128>}, {pipeline_mode = #tpu.pipeline_mode<synchronous>, transform_indices = @transform_4, window_bounds = array<i64: 128, 128>}, {pipeline_mode = #tpu.pipeline_mode<synchronous>, transform_indices = @transform_5, window_bounds = array<i64: 1, 128>}, {pipeline_mode = #tpu.pipeline_mode<synchronous>, transform_indices = @transform_6, window_bounds = array<i64: 128, 8>}, {pipeline_mode = #tpu.pipeline_mode<synchronous>, transform_indices = @transform_7, window_bounds = array<i64: 1, 8>}, {transform_indices = @transform_8, window_bounds = array<i64: 8, 8>}]} {
    %c0_i32 = arith.constant 0 : i32
    %0 = arith.cmpi eq, %arg1, %c0_i32 : i32
    %1 = arith.extui %0 : i1 to i32
    %c0_i32_0 = arith.constant 0 : i32
    %2 = arith.cmpi ne, %1, %c0_i32_0 : i32
    scf.if %2 {
      %cst_10 = arith.constant 0.000000e+00 : f32
      %13 = vector.broadcast %cst_10 : f32 to vector<8x32xf32>
      %c0_11 = arith.constant 0 : index
      %c0_12 = arith.constant 0 : index
      %14 = vector.load %arg11[%c0_11, %c0_12] : memref<8x32xf32, #tpu.memory_space<vmem>>, vector<8x32xf32>
      tpu.vector_store %arg11[%c0_11, %c0_12], %13 {strides = array<i32>} : memref<8x32xf32, #tpu.memory_space<vmem>>, vector<8x32xf32>,
    } else {
    }
    %c0 = arith.constant 0 : index
    %c0_1 = arith.constant 0 : index
    %3 = vector.load %arg3[%c0, %c0_1] : memref<8x16xbf16, #tpu.memory_space<vmem>>, vector<8x16xbf16>
    %c0_2 = arith.constant 0 : index
    %c0_3 = arith.constant 0 : index
    %4 = vector.load %arg2[%c0_2, %c0_3] : memref<16x32xf32, #tpu.memory_space<vmem>>, vector<16x32xf32>
    %5 = arith.extf %3 : vector<8x16xbf16> to vector<8x16xf32>
    %cst = arith.constant dense<0.000000e+00> : vector<8x32xf32>
    %6 = tpu.matmul %5, %4, %cst {dimension_numbers = #tpu.dot_dimension_numbers<[1], [0], [0], [1], [0, 0, 1, 1], [], []>} : vector<8x16xf32>, vector<16x32xf32>, vector<8x32xf32> -> vector<8x32xf32>
    %c0_4 = arith.constant 0 : index
    %c0_5 = arith.constant 0 : index
    %7 = vector.load %arg11[%c0_4, %c0_5] : memref<8x32xf32, #tpu.memory_space<vmem>>, vector<8x32xf32>
    %8 = arith.addf %7, %6 : vector<8x32xf32>
    %c0_6 = arith.constant 0 : index
    %c0_7 = arith.constant 0 : index
    %9 = vector.load %arg11[%c0_6, %c0_7] : memref<8x32xf32, #tpu.memory_space<vmem>>, vector<8x32xf32>
    tpu.vector_store %arg11[%c0_6, %c0_7], %8 {strides = array<i32>} : memref<8x32xf32, #tpu.memory_space<vmem>>, vector<8x32xf32>,
    %c0_i32_8 = arith.constant 0 : i32
    %10 = arith.cmpi eq, %arg1, %c0_i32_8 : i32
    %11 = arith.extui %10 : i1 to i32
    %c0_i32_9 = arith.constant 0 : i32
    %12 = arith.cmpi ne, %11, %c0_i32_9 : i32
    scf.if %12 {
      %c0_10 = arith.constant 0 : index
      %c0_11 = arith.constant 0 : index
      %13 = vector.load %arg11[%c0_10, %c0_11] : memref<8x32xf32, #tpu.memory_space<vmem>>, vector<8x32xf32>
      %c0_12 = arith.constant 0 : index
      %c0_13 = arith.constant 0 : index
      %14 = vector.load %arg4[%c0_12, %c0_13] : memref<32x128xf32, #tpu.memory_space<vmem>>, vector<32x128xf32>
      %cst_14 = arith.constant dense<0.000000e+00> : vector<8x128xf32>
      %15 = tpu.matmul %13, %14, %cst_14 {dimension_numbers = #tpu.dot_dimension_numbers<[1], [0], [0], [1], [0, 0, 1, 1], [], []>} : vector<8x32xf32>, vector<32x128xf32>, vector<8x128xf32> -> vector<8x128xf32>
      %c0_15 = arith.constant 0 : index
      %c0_16 = arith.constant 0 : index
      %16 = vector.load %arg5[%c0_15, %c0_16] : memref<1x128xf32, #tpu.memory_space<vmem>>, vector<1x128xf32>
      %17 = vector.broadcast %16 : vector<1x128xf32> to vector<8x128xf32>
      %18 = arith.addf %15, %17 : vector<8x128xf32>
      %cst_17 = arith.constant 0.000000e+00 : f32
      %19 = vector.broadcast %cst_17 : f32 to vector<8x128xf32>
      %20 = arith.cmpf ogt, %18, %19 : vector<8x128xf32>
      %cst_18 = arith.constant 0.00999999977 : f32
      %21 = vector.broadcast %cst_18 : f32 to vector<8x128xf32>
      %22 = arith.mulf %21, %18 : vector<8x128xf32>
      %23 = arith.select %20, %18, %22 : vector<8x128xi1>, vector<8x128xf32>
      %c0_19 = arith.constant 0 : index
      %c0_20 = arith.constant 0 : index
      %24 = vector.load %arg6[%c0_19, %c0_20] : memref<128x128xf32, #tpu.memory_space<vmem>>, vector<128x128xf32>
      %cst_21 = arith.constant dense<0.000000e+00> : vector<8x128xf32>
      %25 = tpu.matmul %23, %24, %cst_21 {dimension_numbers = #tpu.dot_dimension_numbers<[1], [0], [0], [1], [0, 0, 1, 1], [], []>} : vector<8x128xf32>, vector<128x128xf32>, vector<8x128xf32> -> vector<8x128xf32>
      %c0_22 = arith.constant 0 : index
      %c0_23 = arith.constant 0 : index
      %26 = vector.load %arg7[%c0_22, %c0_23] : memref<1x128xf32, #tpu.memory_space<vmem>>, vector<1x128xf32>
      %27 = vector.broadcast %26 : vector<1x128xf32> to vector<8x128xf32>
      %28 = arith.addf %25, %27 : vector<8x128xf32>
      %cst_24 = arith.constant 0.000000e+00 : f32
      %29 = vector.broadcast %cst_24 : f32 to vector<8x128xf32>
      %30 = arith.cmpf ogt, %28, %29 : vector<8x128xf32>
      %cst_25 = arith.constant 0.00999999977 : f32
      %31 = vector.broadcast %cst_25 : f32 to vector<8x128xf32>
      %32 = arith.mulf %31, %28 : vector<8x128xf32>
      %33 = arith.select %30, %28, %32 : vector<8x128xi1>, vector<8x128xf32>
      %c0_26 = arith.constant 0 : index
      %c0_27 = arith.constant 0 : index
      %34 = vector.load %arg8[%c0_26, %c0_27] : memref<128x8xf32, #tpu.memory_space<vmem>>, vector<128x8xf32>
      %cst_28 = arith.constant dense<0.000000e+00> : vector<8x8xf32>
      %35 = tpu.matmul %33, %34, %cst_28 {dimension_numbers = #tpu.dot_dimension_numbers<[1], [0], [0], [1], [0, 0, 1, 1], [], []>} : vector<8x128xf32>, vector<128x8xf32>, vector<8x8xf32> -> vector<8x8xf32>
      %c0_29 = arith.constant 0 : index
      %c0_30 = arith.constant 0 : index
      %36 = vector.load %arg9[%c0_29, %c0_30] : memref<1x8xf32, #tpu.memory_space<vmem>>, vector<1x8xf32>
      %37 = vector.broadcast %36 : vector<1x8xf32> to vector<8x8xf32>
      %38 = arith.addf %35, %37 : vector<8x8xf32>
      %c0_31 = arith.constant 0 : index
      %c0_32 = arith.constant 0 : index
      %39 = vector.load %arg10[%c0_31, %c0_32] : memref<8x8xf32, #tpu.memory_space<vmem>>, vector<8x8xf32>
      tpu.vector_store %arg10[%c0_31, %c0_32], %38 {strides = array<i32>} : memref<8x8xf32, #tpu.memory_space<vmem>>, vector<8x8xf32>,
    } else {
    }
    return
  }
  func.func @transform_0(%arg0: i32, %arg1: i32) -> (i32, i32) {
    %c0_i32 = arith.constant 0 : i32
    %c0_i32_0 = arith.constant 0 : i32
    return %arg1, %c0_i32 : i32, i32
  }
  func.func @transform_1(%arg0: i32, %arg1: i32) -> (i32, i32) {
    %c0_i32 = arith.constant 0 : i32
    return %arg0, %arg1 : i32, i32
  }
  func.func @transform_2(%arg0: i32, %arg1: i32) -> (i32, i32) {
    %c0_i32 = arith.constant 0 : i32
    %c0_i32_0 = arith.constant 0 : i32
    %c0_i32_1 = arith.constant 0 : i32
    return %c0_i32, %c0_i32_0 : i32, i32
  }
  func.func @transform_3(%arg0: i32, %arg1: i32) -> (i32, i32) {
    %c0_i32 = arith.constant 0 : i32
    %c0_i32_0 = arith.constant 0 : i32
    %c0_i32_1 = arith.constant 0 : i32
    return %c0_i32, %c0_i32_0 : i32, i32
  }
  func.func @transform_4(%arg0: i32, %arg1: i32) -> (i32, i32) {
    %c0_i32 = arith.constant 0 : i32
    %c0_i32_0 = arith.constant 0 : i32
    %c0_i32_1 = arith.constant 0 : i32
    return %c0_i32, %c0_i32_0 : i32, i32
  }
  func.func @transform_5(%arg0: i32, %arg1: i32) -> (i32, i32) {
    %c0_i32 = arith.constant 0 : i32
    %c0_i32_0 = arith.constant 0 : i32
    %c0_i32_1 = arith.constant 0 : i32
    return %c0_i32, %c0_i32_0 : i32, i32
  }
  func.func @transform_6(%arg0: i32, %arg1: i32) -> (i32, i32) {
    %c0_i32 = arith.constant 0 : i32
    %c0_i32_0 = arith.constant 0 : i32
    %c0_i32_1 = arith.constant 0 : i32
    return %c0_i32, %c0_i32_0 : i32, i32
  }
  func.func @transform_7(%arg0: i32, %arg1: i32) -> (i32, i32) {
    %c0_i32 = arith.constant 0 : i32
    %c0_i32_0 = arith.constant 0 : i32
    %c0_i32_1 = arith.constant 0 : i32
    return %c0_i32, %c0_i32_0 : i32, i32
  }
  func.func @transform_8(%arg0: i32, %arg1: i32) -> (i32, i32) {
    %c0_i32 = arith.constant 0 : i32
    %c0_i32_0 = arith.constant 0 : i32
    return %arg0, %c0_i32 : i32, i32
  }
}

</mosaic_0001>

<bundles_post_ra>
// kernel: tpu_custom_call.1
= control target key start
LH: loop header
LB: loop body
LE: loop exit
PB: predicated region body
PF: predicated region fallthrough
CT: control target
= control target key end

     0   :  { %13 = vsyncpa [#allocation4], 0  ;;  %s871_s0 = inlined_call_operand.hbm [shape: f32[16,32], index: 0, kind: input, shape index: {}]   ;;  %s872_s1 = inlined_call_operand.vmem [shape: bf16[8,16], index: 1, kind: input, shape index: {}]   ;;  %s873_s2 = inlined_call_operand.hbm [shape: f32[32,128], index: 2, kind: input, shape index: {}]   ;;  %s874_s3 = inlined_call_operand.vmem [shape: f32[1,128], index: 3, kind: input, shape index: {}]   ;;  %s875_s4 = inlined_call_operand.vmem [shape: f32[128,128], index: 4, kind: input, shape index: {}]   ;;  %s876_s5 = inlined_call_operand.vmem [shape: f32[1,128], index: 5, kind: input, shape index: {}]   ;;  %s877_s6 = inlined_call_operand.vmem [shape: f32[128,8], index: 6, kind: input, shape index: {}]   ;;  %s878_s7 = inlined_call_operand.vmem [shape: f32[1,8], index: 7, kind: input, shape index: {}]   ;;  %s879_s8 = inlined_call_operand.hbm [shape: f32[8,8], index: 8, kind: output, shape index: {}]  }
   0x1   :  { %14 = vsyncpa [#allocation7], 0 }
   0x2   :  { %15 = vsyncpa [#allocation5], 0  ;;  %s652_s27 = smov [#allocation3]  }
   0x3   :  { %s21_s28 = sshll.u32 %s652_s27, 4  ;;  %s22_s28 = int_to_ptr.vmem [resolvable:$true] %s21_s28 }
   0x4   :  { %s594_s29 = scalar_lea.vmem %s22_s28, 256  ;;  %p599_p1 = scmp.lt.s32.totalorder %s22_s28, %s22_s28 }
   0x5   :  { %p595_p0 = scmp.ne.s32.totalorder %s22_s28, %s594_s29  ;;  %p600_p2 = scmp.lt.s32.totalorder %s594_s29, %s594_s29 }
   0x7   :  { %p601_p3 = por %p600_p2, %p599_p1 }
   0x9   :  { %p602_p4 = pnand %p601_p3, %p595_p0 }
   0xb   :  { %605 = shalt.err (!%p602_p4)
}
   0xc   :  { %s653_s30 = smov 128   ;;  %s654_s9 = smov 8  }
   0xd   :  { %27 = dma.hbm_to_vmem [thread:$0]  %s871_s0, 256, %s22_s28, [#allocation4], %s653_s30, %s653_s30, %s654_s9  }
   0xe   :  { %s655_s12 = smov [#allocation6]  }
   0xf   :  { %s35_s13 = sshll.u32 %s655_s12, 4  ;;  %s36_s13 = int_to_ptr.vmem [resolvable:$true] %s35_s13 }
  0x10   :  { %s614_s14 = scalar_lea.vmem %s36_s13, 512  ;;  %p619_p6 = scmp.lt.s32.totalorder %s36_s13, %s36_s13 }
  0x11   :  { %p615_p5 = scmp.ne.s32.totalorder %s36_s13, %s614_s14  ;;  %p620_p7 = scmp.lt.s32.totalorder %s614_s14, %s614_s14 }
  0x13   :  { %p621_p8 = por %p620_p7, %p619_p6 }
  0x15   :  { %p622_p9 = pnand %p621_p8, %p615_p5 }
  0x17   :  { %625 = shalt.err (!%p622_p9)
}
  0x18   :  { %41 = dma.hbm_to_vmem [thread:$0]  %s873_s2, 512, %s36_s13, [#allocation7], %s653_s30, %s653_s30, %s654_s9  }
  0x19   :  { %646 = dma.done.wait [#allocation4], 256  }
  0x1a   :  { %647 = vsyncadd [#allocation4], 4294967040 }
  0x1b   :  { %648 = dma.done.wait [#allocation7], 512  }
  0x1c   :  { %649 = vsyncadd [#allocation7], 4294966784  ;;  %vm62_vm0 = vcmask 261120   ;;  %v656_v0 = vmov 0.0   ;;  %vm657_vm1 = vmmov 0   ;;  %v66_v1 = vld [vmem:[#allocation3 + $0x8] sm:$0xff] }
  0x1d   :  { %491 = vmatprep.subr.mxu0 %v656_v0  ;;  %495 = vmatprep.mubr.msk.f32.mxu0 %vm657_vm1, %v656_v0  ;;  %63 = vst.msk [vmem:[#allocation2] sm:$0xff] %vm62_vm0, %v656_v0  ;;  %v65_v2 = vld [vmem:[#allocation3] sm:$0xff]  ;;  %v64_v3 = vld [vmem:[%s872_s1] sm:$0xf]  ;;  %vm68_vm2 = vcmask 130048   ;;  %v153_v5 = vld [vmem:[#allocation6 + $0x18] sm:$0xff] }
  0x1e   :  { %498 = vmatprep.subr.mxu1 %v656_v0  ;;  %506 = vmatprep.mubr.msk.f32.mxu1 %vm657_vm1, %v656_v0  ;;  %v67_v4 = vunpack.c.l.bf16 %v64_v3  ;;  %v152_v6 = vld [vmem:[#allocation6 + $0x10] sm:$0xff]  ;;  %v151_v7 = vld [vmem:[#allocation6 + $0x8] sm:$0xff]  ;;  %v150_v8 = vld [vmem:[#allocation6] sm:$0xff]  ;;  %s658_s11 = smov [#allocation8]   ;;  %vm426_vm5 = vcmask 64512  }
  0x1f   :  { %492 = vmatpush3.msra.mxu0 %v66_v1  ;;  %499 = vmatpush3.msra.mxu1 %v153_v5  ;;  %v252_v9 = vld [vmem:[%s875_s4 + $0x78] sm:$0xff]  ;;  %v251_v10 = vld [vmem:[%s875_s4 + $0x70] sm:$0xff]  ;;  %v250_v11 = vld [vmem:[%s875_s4 + $0x68] sm:$0xff] }
  0x20   :  { %493 = vmatprep.subr.mxu0 %v656_v0  ;;  %500 = vmatprep.subr.mxu1 %v656_v0  ;;  %v249_v12 = vld [vmem:[%s875_s4 + $0x60] sm:$0xff]  ;;  %v248_v13 = vld [vmem:[%s875_s4 + $0x58] sm:$0xff]  ;;  %v247_v14 = vld [vmem:[%s875_s4 + $0x50] sm:$0xff] }
  0x21   :  { %494 = vmatpush3.msra.mxu0 %v65_v2  ;;  %501 = vmatpush3.msra.mxu1 %v152_v6  ;;  %v246_v15 = vld [vmem:[%s875_s4 + $0x48] sm:$0xff]  ;;  %v245_v16 = vld [vmem:[%s875_s4 + $0x40] sm:$0xff]  ;;  %v244_v17 = vld [vmem:[%s875_s4 + $0x38] sm:$0xff] }
  0x22   :  { %496 = vmatmul.mubr.msk.f32.vlgmr.msra.gmra.mxu0 %vm68_vm2, %v67_v4  ;;  %509 = vmatprep.subr.mxu0 %v656_v0  ;;  %v243_v18 = vld [vmem:[%s875_s4 + $0x30] sm:$0xff]  ;;  %v242_v19 = vld [vmem:[%s875_s4 + $0x28] sm:$0xff]  ;;  %v241_v20 = vld [vmem:[%s875_s4 + $0x20] sm:$0xff] }
  0x23   :  { %541 = vmatprep.mubr.msk.f32.mxu0 %vm657_vm1, %v656_v0  ;;  %502 = vmatprep.subr.mxu1 %v656_v0  ;;  %v240_v21 = vld [vmem:[%s875_s4 + $0x18] sm:$0xff]  ;;  %v239_v27 = vld [vmem:[%s875_s4 + $0x10] sm:$0xff]  ;;  %v238_v28 = vld [vmem:[%s875_s4 + $0x8] sm:$0xff] }
  0x24   :  { %503 = vmatpush3.msra.mxu1 %v151_v7  ;;  %510 = vmatpush3.msra.mxu0 %v252_v9  ;;  %v142_v22 = vld [vmem:[#allocation2] sm:$0xff]  ;;  %v348_v30 = vld [vmem:[%s877_s6 + $0x78] sm:$0xff]  ;;  %v347_v31 = vld [vmem:[%s877_s6 + $0x70] sm:$0xff] }
  0x25   :  { %504 = vmatprep.subr.mxu1 %v656_v0  ;;  %511 = vmatprep.subr.mxu0 %v656_v0  ;;  %v237_v29 = vld [vmem:[%s875_s4] sm:$0xff]  ;;  %v346_v32 = vld [vmem:[%s877_s6 + $0x68] sm:$0xff]  ;;  %v344_v34 = vld [vmem:[%s877_s6 + $0x58] sm:$0xff] }
  0x26   :  { %505 = vmatpush3.msra.mxu1 %v150_v8  ;;  %512 = vmatpush3.msra.mxu0 %v251_v10  ;;  %v345_v33 = vld [vmem:[%s877_s6 + $0x60] sm:$0xff]  ;;  %v343_v35 = vld [vmem:[%s877_s6 + $0x50] sm:$0xff]  ;;  %v342_v36 = vld [vmem:[%s877_s6 + $0x48] sm:$0xff] }
  0x27   :  { %544 = vmatprep.subr.mxu1 %v656_v0  ;;  %513 = vmatprep.subr.mxu0 %v656_v0  ;;  %v341_v37 = vld [vmem:[%s877_s6 + $0x40] sm:$0xff]  ;;  %v340_v38 = vld [vmem:[%s877_s6 + $0x38] sm:$0xff]  ;;  %v339_v39 = vld [vmem:[%s877_s6 + $0x30] sm:$0xff] }
  0x28   :  { %514 = vmatpush3.msra.mxu0 %v250_v11  ;;  %v338_v40 = vld [vmem:[%s877_s6 + $0x28] sm:$0xff]  ;;  %v337_v41 = vld [vmem:[%s877_s6 + $0x20] sm:$0xff]  ;;  %v336_v42 = vld [vmem:[%s877_s6 + $0x18] sm:$0xff] }
  0x29   :  { %515 = vmatprep.subr.mxu0 %v656_v0  ;;  %v445_v43 = vld [vmem:[%s874_s3] ss:$0 sm:$0xff]  ;;  %v335_v49 = vld [vmem:[%s877_s6 + $0x10] sm:$0xff]  ;;  %v334_v50 = vld [vmem:[%s877_s6 + $0x8] sm:$0xff] }
  0x2a   :  { %516 = vmatpush3.msra.mxu0 %v249_v12  ;;  %v333_v51 = vld [vmem:[%s877_s6] sm:$0xff]  ;;  %s434_s6 = sshll.u32 %s658_s11, 4  ;;  %s435_s6 = int_to_ptr.vmem [resolvable:$true] %s434_s6 }
  0x2b   :  { %517 = vmatprep.subr.mxu0 %v656_v0  ;;  %v447_v52 = vld [vmem:[%s876_s5] ss:$0 sm:$0xff]  ;;  %s626_s5 = scalar_lea.vmem %s435_s6, 128  ;;  %p631_p11 = scmp.lt.s32.totalorder %s435_s6, %s435_s6 }
  0x2c   :  { %518 = vmatpush3.msra.mxu0 %v248_v13  ;;  %v448_v58 = vld [vmem:[%s878_s7] ss:$0 sm:$0xff]  ;;  %p627_p10 = scmp.ne.s32.totalorder %s435_s6, %s626_s5  ;;  %p632_p12 = scmp.lt.s32.totalorder %s626_s5, %s626_s5 }
  0x2d   :  { %519 = vmatprep.subr.mxu0 %v656_v0 }
  0x2e   :  { %520 = vmatpush3.msra.mxu0 %v247_v14  ;;  %p633_p13 = por %p632_p12, %p631_p11 }
  0x2f   :  { %521 = vmatprep.subr.mxu0 %v656_v0 }
  0x30   :  { %522 = vmatpush3.msra.mxu0 %v246_v15  ;;  %p634_p0 = pnand %p633_p13, %p627_p10 }
  0x31   :  { %523 = vmatprep.subr.mxu0 %v656_v0 }
  0x32   :  { %524 = vmatpush3.msra.mxu0 %v245_v16 }
  0x33   :  { %525 = vmatprep.subr.mxu0 %v656_v0 }
  0x34   :  { %526 = vmatpush3.msra.mxu0 %v244_v17 }
  0x35   :  { %527 = vmatprep.subr.mxu0 %v656_v0 }
  0x36   :  { %528 = vmatpush3.msra.mxu0 %v243_v18 }
  0x37   :  { %529 = vmatprep.subr.mxu0 %v656_v0 }
  0x38   :  { %530 = vmatpush3.msra.mxu0 %v242_v19 }
  0x39   :  { %531 = vmatprep.subr.mxu0 %v656_v0 }
  0x3a   :  { %532 = vmatpush3.msra.mxu0 %v241_v20 }
  0x3b   :  { %533 = vmatprep.subr.mxu0 %v656_v0 }
  0x3c   :  { %534 = vmatpush3.msra.mxu0 %v240_v21 }
  0x3d   :  { %535 = vmatprep.subr.mxu0 %v656_v0 }
  0x3e   :  { %536 = vmatpush3.msra.mxu0 %v239_v27 }
  0x3f   :  { %537 = vmatprep.subr.mxu0 %v656_v0 }
  0x40   :  { %538 = vmatpush3.msra.mxu0 %v238_v28 }
  0x41   :  { %539 = vmatprep.subr.mxu0 %v656_v0 }
  0x42   :  { %540 = vmatpush3.msra.mxu0 %v237_v29 }
  0xe2   :  { %v138_v23 = vpop.f32.mrf.mxu0 }
  0xe3   :  { %v143_v24 = vadd.f32 %v142_v22, %v138_v23 }
  0xe4   :  { %v497_v25 = vpop.f32.mrf.mxu0 }
  0xe5   :  { %145 = vst.msk [vmem:[#allocation2] sm:$0xff] %vm62_vm0, %v143_v24 }
  0xec   :  { %v149_v26 = vld [vmem:[#allocation2] sm:$0xff] }
  0xed   :  { %507 = vmatmul.mubr.msk.f32.vlgmr.msra.gmra.mxu1 %vm62_vm0, %v149_v26 }
  0xee   :  { %576 = vmatprep.mubr.msk.f32.mxu1 %vm657_vm1, %v656_v0  ;;  %545 = vmatpush3.msra.mxu1 %v348_v30 }
  0xef   :  { %546 = vmatprep.subr.mxu1 %v656_v0 }
  0xf0   :  { %547 = vmatpush3.msra.mxu1 %v347_v31 }
  0xf1   :  { %548 = vmatprep.subr.mxu1 %v656_v0 }
  0xf2   :  { %549 = vmatpush3.msra.mxu1 %v346_v32 }
  0xf3   :  { %550 = vmatprep.subr.mxu1 %v656_v0 }
  0xf4   :  { %551 = vmatpush3.msra.mxu1 %v345_v33 }
  0xf5   :  { %552 = vmatprep.subr.mxu1 %v656_v0 }
  0xf6   :  { %553 = vmatpush3.msra.mxu1 %v344_v34 }
  0xf7   :  { %554 = vmatprep.subr.mxu1 %v656_v0 }
  0xf8   :  { %555 = vmatpush3.msra.mxu1 %v343_v35 }
  0xf9   :  { %556 = vmatprep.subr.mxu1 %v656_v0 }
  0xfa   :  { %557 = vmatpush3.msra.mxu1 %v342_v36 }
  0xfb   :  { %558 = vmatprep.subr.mxu1 %v656_v0 }
  0xfc   :  { %559 = vmatpush3.msra.mxu1 %v341_v37 }
  0xfd   :  { %560 = vmatprep.subr.mxu1 %v656_v0 }
  0xfe   :  { %561 = vmatpush3.msra.mxu1 %v340_v38 }
  0xff   :  { %562 = vmatprep.subr.mxu1 %v656_v0 }
 0x100   :  { %563 = vmatpush3.msra.mxu1 %v339_v39 }
 0x101   :  { %564 = vmatprep.subr.mxu1 %v656_v0 }
 0x102   :  { %565 = vmatpush3.msra.mxu1 %v338_v40 }
 0x103   :  { %566 = vmatprep.subr.mxu1 %v656_v0 }
 0x104   :  { %567 = vmatpush3.msra.mxu1 %v337_v41 }
 0x105   :  { %568 = vmatprep.subr.mxu1 %v656_v0 }
 0x106   :  { %569 = vmatpush3.msra.mxu1 %v336_v42 }
 0x107   :  { %570 = vmatprep.subr.mxu1 %v656_v0 }
 0x108   :  { %571 = vmatpush3.msra.mxu1 %v335_v49 }
 0x109   :  { %572 = vmatprep.subr.mxu1 %v656_v0 }
 0x10a   :  { %573 = vmatpush3.msra.mxu1 %v334_v50 }
 0x10b   :  { %574 = vmatprep.subr.mxu1 %v656_v0 }
 0x10c   :  { %575 = vmatpush3.msra.mxu1 %v333_v51 }
 0x1ad   :  { %v230_v44 = vpop.f32.mrf.mxu1 }
 0x1ae   :  { %v231_v45 = vadd.f32 %v445_v43, %v230_v44 }
 0x1af   :  { %v508_v46 = vpop.f32.mrf.mxu1 }
 0x1b0   :  { %vm234_vm3 = vcmp.gt.f32.partialorder %v231_v45, 0.0  ;;  %v235_v47 = vmul.f32 0.01, %v231_v45 }
 0x1b2   :  { %v236_v48 = vsel %vm234_vm3, %v231_v45, %v235_v47 }
 0x1b3   :  { %542 = vmatmul.mubr.f32.vlgmr.msra.gmra.mxu0 %v236_v48 }
 0x273   :  { %v326_v53 = vpop.f32.mrf.mxu0 }
 0x274   :  { %v327_v54 = vadd.f32 %v447_v52, %v326_v53 }
 0x275   :  { %v543_v55 = vpop.f32.mrf.mxu0 }
 0x276   :  { %vm330_vm4 = vcmp.gt.f32.partialorder %v327_v54, 0.0  ;;  %v331_v56 = vmul.f32 0.01, %v327_v54 }
 0x278   :  { %v332_v57 = vsel %vm330_vm4, %v327_v54, %v331_v56 }
 0x279   :  { %577 = vmatmul.mubr.f32.vlgmr.msra.gmra.mxu1 %v332_v57 }
 0x339   :  { %v422_v59 = vpop.f32.mrf.mxu1 }
 0x33a   :  { %v423_v60 = vadd.f32 %v448_v58, %v422_v59 }
 0x33b   :  { %v578_v61 = vpop.f32.mrf.mxu1 }
 0x33c   :  { %427 = vst.msk [vmem:[#allocation8] sm:$0xff] %vm426_vm5, %v423_v60 }
 0x33d   :  { %637 = shalt.err (!%p634_p0)
}
 0x33e   :  { %437 = dma.vmem_to_hbm [thread:$0]  %s435_s6, 128, %s879_s8, [#allocation5]  }
 0x33f   :  { %650 = dma.done.wait [#allocation5], 128  }
 0x340   :  { %651 = vsyncadd [#allocation5], 4294967168 }
 0x341   :  { %441 = vsyncpa [#allocation4], 1 }
 0x342   :  { %442 = vsyncpa [#allocation7], 1 }
 0x343   :  { %443 = vsyncpa [#allocation5], 1 }

// kernel: tpu_custom_call.1
= control target key start
LH: loop header
LB: loop body
LE: loop exit
PB: predicated region body
PF: predicated region fallthrough
CT: control target
= control target key end

     0   :  { %13 = vsyncpa [#allocation4], 0  ;;  %s871_s0 = inlined_call_operand.hbm [shape: f32[16,32], index: 0, kind: input, shape index: {}]   ;;  %s872_s1 = inlined_call_operand.vmem [shape: bf16[8,16], index: 1, kind: input, shape index: {}]   ;;  %s873_s2 = inlined_call_operand.hbm [shape: f32[32,128], index: 2, kind: input, shape index: {}]   ;;  %s874_s3 = inlined_call_operand.vmem [shape: f32[1,128], index: 3, kind: input, shape index: {}]   ;;  %s875_s4 = inlined_call_operand.vmem [shape: f32[128,128], index: 4, kind: input, shape index: {}]   ;;  %s876_s5 = inlined_call_operand.vmem [shape: f32[1,128], index: 5, kind: input, shape index: {}]   ;;  %s877_s6 = inlined_call_operand.vmem [shape: f32[128,8], index: 6, kind: input, shape index: {}]   ;;  %s878_s7 = inlined_call_operand.vmem [shape: f32[1,8], index: 7, kind: input, shape index: {}]   ;;  %s879_s8 = inlined_call_operand.hbm [shape: f32[8,8], index: 8, kind: output, shape index: {}]  }
   0x1   :  { %14 = vsyncpa [#allocation7], 0 }
   0x2   :  { %15 = vsyncpa [#allocation5], 0  ;;  %s652_s27 = smov [#allocation3]  }
   0x3   :  { %s21_s28 = sshll.u32 %s652_s27, 4  ;;  %s22_s28 = int_to_ptr.vmem [resolvable:$true] %s21_s28 }
   0x4   :  { %s594_s29 = scalar_lea.vmem %s22_s28, 256  ;;  %p599_p1 = scmp.lt.s32.totalorder %s22_s28, %s22_s28 }
   0x5   :  { %p595_p0 = scmp.ne.s32.totalorder %s22_s28, %s594_s29  ;;  %p600_p2 = scmp.lt.s32.totalorder %s594_s29, %s594_s29 }
   0x7   :  { %p601_p3 = por %p600_p2, %p599_p1 }
   0x9   :  { %p602_p4 = pnand %p601_p3, %p595_p0 }
   0xb   :  { %605 = shalt.err (!%p602_p4)
}
   0xc   :  { %s653_s30 = smov 128   ;;  %s654_s9 = smov 8  }
   0xd   :  { %27 = dma.hbm_to_vmem [thread:$0]  %s871_s0, 256, %s22_s28, [#allocation4], %s653_s30, %s653_s30, %s654_s9  }
   0xe   :  { %s655_s12 = smov [#allocation6]  }
   0xf   :  { %s35_s13 = sshll.u32 %s655_s12, 4  ;;  %s36_s13 = int_to_ptr.vmem [resolvable:$true] %s35_s13 }
  0x10   :  { %s614_s14 = scalar_lea.vmem %s36_s13, 512  ;;  %p619_p6 = scmp.lt.s32.totalorder %s36_s13, %s36_s13 }
  0x11   :  { %p615_p5 = scmp.ne.s32.totalorder %s36_s13, %s614_s14  ;;  %p620_p7 = scmp.lt.s32.totalorder %s614_s14, %s614_s14 }
  0x13   :  { %p621_p8 = por %p620_p7, %p619_p6 }
  0x15   :  { %p622_p9 = pnand %p621_p8, %p615_p5 }
  0x17   :  { %625 = shalt.err (!%p622_p9)
}
  0x18   :  { %41 = dma.hbm_to_vmem [thread:$0]  %s873_s2, 512, %s36_s13, [#allocation7], %s653_s30, %s653_s30, %s654_s9  }
  0x19   :  { %646 = dma.done.wait [#allocation4], 256  }
  0x1a   :  { %647 = vsyncadd [#allocation4], 4294967040 }
  0x1b   :  { %648 = dma.done.wait [#allocation7], 512  }
  0x1c   :  { %649 = vsyncadd [#allocation7], 4294966784  ;;  %vm62_vm0 = vcmask 261120   ;;  %v656_v0 = vmov 0.0   ;;  %vm657_vm1 = vmmov 0   ;;  %v66_v1 = vld [vmem:[#allocation3 + $0x8] sm:$0xff] }
  0x1d   :  { %491 = vmatprep.subr.mxu0 %v656_v0  ;;  %495 = vmatprep.mubr.msk.f32.mxu0 %vm657_vm1, %v656_v0  ;;  %63 = vst.msk [vmem:[#allocation2] sm:$0xff] %vm62_vm0, %v656_v0  ;;  %v65_v2 = vld [vmem:[#allocation3] sm:$0xff]  ;;  %v64_v3 = vld [vmem:[%s872_s1] sm:$0xf]  ;;  %vm68_vm2 = vcmask 130048   ;;  %v153_v5 = vld [vmem:[#allocation6 + $0x18] sm:$0xff] }
  0x1e   :  { %498 = vmatprep.subr.mxu1 %v656_v0  ;;  %506 = vmatprep.mubr.msk.f32.mxu1 %vm657_vm1, %v656_v0  ;;  %v67_v4 = vunpack.c.l.bf16 %v64_v3  ;;  %v152_v6 = vld [vmem:[#allocation6 + $0x10] sm:$0xff]  ;;  %v151_v7 = vld [vmem:[#allocation6 + $0x8] sm:$0xff]  ;;  %v150_v8 = vld [vmem:[#allocation6] sm:$0xff]  ;;  %s658_s11 = smov [#allocation8]   ;;  %vm426_vm5 = vcmask 64512  }
  0x1f   :  { %492 = vmatpush3.msra.mxu0 %v66_v1  ;;  %499 = vmatpush3.msra.mxu1 %v153_v5  ;;  %v252_v9 = vld [vmem:[%s875_s4 + $0x78] sm:$0xff]  ;;  %v251_v10 = vld [vmem:[%s875_s4 + $0x70] sm:$0xff]  ;;  %v250_v11 = vld [vmem:[%s875_s4 + $0x68] sm:$0xff] }
  0x20   :  { %493 = vmatprep.subr.mxu0 %v656_v0  ;;  %500 = vmatprep.subr.mxu1 %v656_v0  ;;  %v249_v12 = vld [vmem:[%s875_s4 + $0x60] sm:$0xff]  ;;  %v248_v13 = vld [vmem:[%s875_s4 + $0x58] sm:$0xff]  ;;  %v247_v14 = vld [vmem:[%s875_s4 + $0x50] sm:$0xff] }
  0x21   :  { %494 = vmatpush3.msra.mxu0 %v65_v2  ;;  %501 = vmatpush3.msra.mxu1 %v152_v6  ;;  %v246_v15 = vld [vmem:[%s875_s4 + $0x48] sm:$0xff]  ;;  %v245_v16 = vld [vmem:[%s875_s4 + $0x40] sm:$0xff]  ;;  %v244_v17 = vld [vmem:[%s875_s4 + $0x38] sm:$0xff] }
  0x22   :  { %496 = vmatmul.mubr.msk.f32.vlgmr.msra.gmra.mxu0 %vm68_vm2, %v67_v4  ;;  %509 = vmatprep.subr.mxu0 %v656_v0  ;;  %v243_v18 = vld [vmem:[%s875_s4 + $0x30] sm:$0xff]  ;;  %v242_v19 = vld [vmem:[%s875_s4 + $0x28] sm:$0xff]  ;;  %v241_v20 = vld [vmem:[%s875_s4 + $0x20] sm:$0xff] }
  0x23   :  { %541 = vmatprep.mubr.msk.f32.mxu0 %vm657_vm1, %v656_v0  ;;  %502 = vmatprep.subr.mxu1 %v656_v0  ;;  %v240_v21 = vld [vmem:[%s875_s4 + $0x18] sm:$0xff]  ;;  %v239_v27 = vld [vmem:[%s875_s4 + $0x10] sm:$0xff]  ;;  %v238_v28 = vld [vmem:[%s875_s4 + $0x8] sm:$0xff] }
  0x24   :  { %503 = vmatpush3.msra.mxu1 %v151_v7  ;;  %510 = vmatpush3.msra.mxu0 %v252_v9  ;;  %v142_v22 = vld [vmem:[#allocation2] sm:$0xff]  ;;  %v348_v30 = vld [vmem:[%s877_s6 + $0x78] sm:$0xff]  ;;  %v347_v31 = vld [vmem:[%s877_s6 + $0x70] sm:$0xff] }
  0x25   :  { %504 = vmatprep.subr.mxu1 %v656_v0  ;;  %511 = vmatprep.subr.mxu0 %v656_v0  ;;  %v237_v29 = vld [vmem:[%s875_s4] sm:$0xff]  ;;  %v346_v32 = vld [vmem:[%s877_s6 + $0x68] sm:$0xff]  ;;  %v344_v34 = vld [vmem:[%s877_s6 + $0x58] sm:$0xff] }
  0x26   :  { %505 = vmatpush3.msra.mxu1 %v150_v8  ;;  %512 = vmatpush3.msra.mxu0 %v251_v10  ;;  %v345_v33 = vld [vmem:[%s877_s6 + $0x60] sm:$0xff]  ;;  %v343_v35 = vld [vmem:[%s877_s6 + $0x50] sm:$0xff]  ;;  %v342_v36 = vld [vmem:[%s877_s6 + $0x48] sm:$0xff] }
  0x27   :  { %544 = vmatprep.subr.mxu1 %v656_v0  ;;  %513 = vmatprep.subr.mxu0 %v656_v0  ;;  %v341_v37 = vld [vmem:[%s877_s6 + $0x40] sm:$0xff]  ;;  %v340_v38 = vld [vmem:[%s877_s6 + $0x38] sm:$0xff]  ;;  %v339_v39 = vld [vmem:[%s877_s6 + $0x30] sm:$0xff] }
  0x28   :  { %514 = vmatpush3.msra.mxu0 %v250_v11  ;;  %v338_v40 = vld [vmem:[%s877_s6 + $0x28] sm:$0xff]  ;;  %v337_v41 = vld [vmem:[%s877_s6 + $0x20] sm:$0xff]  ;;  %v336_v42 = vld [vmem:[%s877_s6 + $0x18] sm:$0xff] }
  0x29   :  { %515 = vmatprep.subr.mxu0 %v656_v0  ;;  %v445_v43 = vld [vmem:[%s874_s3] ss:$0 sm:$0xff]  ;;  %v335_v49 = vld [vmem:[%s877_s6 + $0x10] sm:$0xff]  ;;  %v334_v50 = vld [vmem:[%s877_s6 + $0x8] sm:$0xff] }
  0x2a   :  { %516 = vmatpush3.msra.mxu0 %v249_v12  ;;  %v333_v51 = vld [vmem:[%s877_s6] sm:$0xff]  ;;  %s434_s6 = sshll.u32 %s658_s11, 4  ;;  %s435_s6 = int_to_ptr.vmem [resolvable:$true] %s434_s6 }
  0x2b   :  { %517 = vmatprep.subr.mxu0 %v656_v0  ;;  %v447_v52 = vld [vmem:[%s876_s5] ss:$0 sm:$0xff]  ;;  %s626_s5 = scalar_lea.vmem %s435_s6, 128  ;;  %p631_p11 = scmp.lt.s32.totalorder %s435_s6, %s435_s6 }
  0x2c   :  { %518 = vmatpush3.msra.mxu0 %v248_v13  ;;  %v448_v58 = vld [vmem:[%s878_s7] ss:$0 sm:$0xff]  ;;  %p627_p10 = scmp.ne.s32.totalorder %s435_s6, %s626_s5  ;;  %p632_p12 = scmp.lt.s32.totalorder %s626_s5, %s626_s5 }
  0x2d   :  { %519 = vmatprep.subr.mxu0 %v656_v0 }
  0x2e   :  { %520 = vmatpush3.msra.mxu0 %v247_v14  ;;  %p633_p13 = por %p632_p12, %p631_p11 }
  0x2f   :  { %521 = vmatprep.subr.mxu0 %v656_v0 }
  0x30   :  { %522 = vmatpush3.msra.mxu0 %v246_v15  ;;  %p634_p0 = pnand %p633_p13, %p627_p10 }
  0x31   :  { %523 = vmatprep.subr.mxu0 %v656_v0 }
  0x32   :  { %524 = vmatpush3.msra.mxu0 %v245_v16 }
  0x33   :  { %525 = vmatprep.subr.mxu0 %v656_v0 }
  0x34   :  { %526 = vmatpush3.msra.mxu0 %v244_v17 }
  0x35   :  { %527 = vmatprep.subr.mxu0 %v656_v0 }
  0x36   :  { %528 = vmatpush3.msra.mxu0 %v243_v18 }
  0x37   :  { %529 = vmatprep.subr.mxu0 %v656_v0 }
  0x38   :  { %530 = vmatpush3.msra.mxu0 %v242_v19 }
  0x39   :  { %531 = vmatprep.subr.mxu0 %v656_v0 }
  0x3a   :  { %532 = vmatpush3.msra.mxu0 %v241_v20 }
  0x3b   :  { %533 = vmatprep.subr.mxu0 %v656_v0 }
  0x3c   :  { %534 = vmatpush3.msra.mxu0 %v240_v21 }
  0x3d   :  { %535 = vmatprep.subr.mxu0 %v656_v0 }
  0x3e   :  { %536 = vmatpush3.msra.mxu0 %v239_v27 }
  0x3f   :  { %537 = vmatprep.subr.mxu0 %v656_v0 }
  0x40   :  { %538 = vmatpush3.msra.mxu0 %v238_v28 }
  0x41   :  { %539 = vmatprep.subr.mxu0 %v656_v0 }
  0x42   :  { %540 = vmatpush3.msra.mxu0 %v237_v29 }
  0xe2   :  { %v138_v23 = vpop.f32.mrf.mxu0 }
  0xe3   :  { %v143_v24 = vadd.f32 %v142_v22, %v138_v23 }
  0xe4   :  { %v497_v25 = vpop.f32.mrf.mxu0 }
  0xe5   :  { %145 = vst.msk [vmem:[#allocation2] sm:$0xff] %vm62_vm0, %v143_v24 }
  0xec   :  { %v149_v26 = vld [vmem:[#allocation2] sm:$0xff] }
  0xed   :  { %507 = vmatmul.mubr.msk.f32.vlgmr.msra.gmra.mxu1 %vm62_vm0, %v149_v26 }
  0xee   :  { %576 = vmatprep.mubr.msk.f32.mxu1 %vm657_vm1, %v656_v0  ;;  %545 = vmatpush3.msra.mxu1 %v348_v30 }
  0xef   :  { %546 = vmatprep.subr.mxu1 %v656_v0 }
  0xf0   :  { %547 = vmatpush3.msra.mxu1 %v347_v31 }
  0xf1   :  { %548 = vmatprep.subr.mxu1 %v656_v0 }
  0xf2   :  { %549 = vmatpush3.msra.mxu1 %v346_v32 }
  0xf3   :  { %550 = vmatprep.subr.mxu1 %v656_v0 }
  0xf4   :  { %551 = vmatpush3.msra.mxu1 %v345_v33 }
  0xf5   :  { %552 = vmatprep.subr.mxu1 %v656_v0 }
  0xf6   :  { %553 = vmatpush3.msra.mxu1 %v344_v34 }
  0xf7   :  { %554 = vmatprep.subr.mxu1 %v656_v0 }
  0xf8   :  { %555 = vmatpush3.msra.mxu1 %v343_v35 }
  0xf9   :  { %556 = vmatprep.subr.mxu1 %v656_v0 }
  0xfa   :  { %557 = vmatpush3.msra.mxu1 %v342_v36 }
  0xfb   :  { %558 = vmatprep.subr.mxu1 %v656_v0 }
  0xfc   :  { %559 = vmatpush3.msra.mxu1 %v341_v37 }
  0xfd   :  { %560 = vmatprep.subr.mxu1 %v656_v0 }
  0xfe   :  { %561 = vmatpush3.msra.mxu1 %v340_v38 }
  0xff   :  { %562 = vmatprep.subr.mxu1 %v656_v0 }
 0x100   :  { %563 = vmatpush3.msra.mxu1 %v339_v39 }
 0x101   :  { %564 = vmatprep.subr.mxu1 %v656_v0 }
 0x102   :  { %565 = vmatpush3.msra.mxu1 %v338_v40 }
 0x103   :  { %566 = vmatprep.subr.mxu1 %v656_v0 }
 0x104   :  { %567 = vmatpush3.msra.mxu1 %v337_v41 }
 0x105   :  { %568 = vmatprep.subr.mxu1 %v656_v0 }
 0x106   :  { %569 = vmatpush3.msra.mxu1 %v336_v42 }
 0x107   :  { %570 = vmatprep.subr.mxu1 %v656_v0 }
 0x108   :  { %571 = vmatpush3.msra.mxu1 %v335_v49 }
 0x109   :  { %572 = vmatprep.subr.mxu1 %v656_v0 }
 0x10a   :  { %573 = vmatpush3.msra.mxu1 %v334_v50 }
 0x10b   :  { %574 = vmatprep.subr.mxu1 %v656_v0 }
 0x10c   :  { %575 = vmatpush3.msra.mxu1 %v333_v51 }
 0x1ad   :  { %v230_v44 = vpop.f32.mrf.mxu1 }
 0x1ae   :  { %v231_v45 = vadd.f32 %v445_v43, %v230_v44 }
 0x1af   :  { %v508_v46 = vpop.f32.mrf.mxu1 }
 0x1b0   :  { %vm234_vm3 = vcmp.gt.f32.partialorder %v231_v45, 0.0  ;;  %v235_v47 = vmul.f32 0.01, %v231_v45 }
 0x1b2   :  { %v236_v48 = vsel %vm234_vm3, %v231_v45, %v235_v47 }
 0x1b3   :  { %542 = vmatmul.mubr.f32.vlgmr.msra.gmra.mxu0 %v236_v48 }
 0x273   :  { %v326_v53 = vpop.f32.mrf.mxu0 }
 0x274   :  { %v327_v54 = vadd.f32 %v447_v52, %v326_v53 }
 0x275   :  { %v543_v55 = vpop.f32.mrf.mxu0 }
 0x276   :  { %vm330_vm4 = vcmp.gt.f32.partialorder %v327_v54, 0.0  ;;  %v331_v56 = vmul.f32 0.01, %v327_v54 }
 0x278   :  { %v332_v57 = vsel %vm330_vm4, %v327_v54, %v331_v56 }
 0x279   :  { %577 = vmatmul.mubr.f32.vlgmr.msra.gmra.mxu1 %v332_v57 }
 0x339   :  { %v422_v59 = vpop.f32.mrf.mxu1 }
 0x33a   :  { %v423_v60 = vadd.f32 %v448_v58, %v422_v59 }
 0x33b   :  { %v578_v61 = vpop.f32.mrf.mxu1 }
 0x33c   :  { %427 = vst.msk [vmem:[#allocation8] sm:$0xff] %vm426_vm5, %v423_v60 }
 0x33d   :  { %637 = shalt.err (!%p634_p0)
}
 0x33e   :  { %437 = dma.vmem_to_hbm [thread:$0]  %s435_s6, 128, %s879_s8, [#allocation5]  }
 0x33f   :  { %650 = dma.done.wait [#allocation5], 128  }
 0x340   :  { %651 = vsyncadd [#allocation5], 4294967168 }
 0x341   :  { %441 = vsyncpa [#allocation4], 1 }
 0x342   :  { %442 = vsyncpa [#allocation7], 1 }
 0x343   :  { %443 = vsyncpa [#allocation5], 1 }

</bundles_post_ra>
